<compile_context>
chip_gen: v6e
topology: v6e:2x2x1
jax: 0.10.0
libtpu: 0.0.40
codegen_flags: <defaults>
</compile_context>

<pallas_src>
import functools

import numpy as np
import jax
import jax.numpy as jnp
from jax.experimental import pallas as pl
from jax.experimental.pallas import tpu as pltpu


# ----------------------------- Pallas kernel --------------------------------


def _cbam_kernel(x_ref, w1_ref, w2_ref, o_ref):
    # x_ref : (1, C, HW)   one batch element, channels on sublanes, spatial on lanes
    # w1_ref: (Cr, C)      fc1 weight (Conv2d(C, Cr, 1, bias=False).weight squeezed)
    # w2_ref: (C, Cr)      fc2 weight (Conv2d(Cr, C, 1, bias=False).weight squeezed)
    # o_ref : (1, C, HW)
    _, C, HW = x_ref.shape
    x = x_ref[0]                                            # (C, HW) f32

    # Global average / max pool over spatial (lane reduce on XLU).
    avg_p = jnp.mean(x, axis=1, keepdims=True)              # (C, 1)
    max_p = jnp.max(x, axis=1, keepdims=True)               # (C, 1)

    def shared_mlp(p):                                      # p: (C, 1)
        h = jnp.dot(w1_ref[...], p,
                    preferred_element_type=jnp.float32)     # (Cr, 1)
        h = jnp.maximum(h, 0.0)
        return jnp.dot(w2_ref[...], h,
                       preferred_element_type=jnp.float32)  # (C, 1)

    y = shared_mlp(avg_p) + shared_mlp(max_p)               # (C, 1)
    s = 1.0 / (1.0 + jnp.exp(-y))                           # sigmoid (EUP), (C, 1)

    # Broadcast channel gate over spatial and store lane-dense.
    o_ref[0] = (x * s).astype(o_ref.dtype)


# ----------------------------- wrapper ---------------------------------------


def cbam_forward(x_nchw, w1, w2):
    """CBAM forward. x_nchw: (B, C, H, W); w1: (C//16, C); w2: (C, C//16)."""
    B, C, H, W = x_nchw.shape
    HW = H * W
    Cr = w1.shape[0]
    x = x_nchw.reshape(B, C, HW)                            # view-only reshape

    out = pl.pallas_call(
        _cbam_kernel,
        out_shape=jax.ShapeDtypeStruct((B, C, HW), jnp.float32),
        grid=(B,),
        in_specs=[
            pl.BlockSpec((1, C, HW), lambda b: (b, 0, 0)),
            pl.BlockSpec((Cr, C), lambda b: (0, 0)),
            pl.BlockSpec((C, Cr), lambda b: (0, 0)),
        ],
        out_specs=pl.BlockSpec((1, C, HW), lambda b: (b, 0, 0)),
        compiler_params=pltpu.CompilerParams(
            dimension_semantics=("parallel",)),
    )(x, w1, w2)

    return out.reshape(B, C, H, W)


# ----------------------------- init & reference ------------------------------


def init_params(key, in_channels):
    # Matches the PyTorch module: fc1 = Conv2d(C, C//16, 1, bias=False),
    # fc2 = Conv2d(C//16, C, 1, bias=False), kaiming_normal_(fan_in, relu).
    cr = in_channels // 16
    k1, k2 = jax.random.split(key)
    w1 = jax.random.normal(k1, (cr, in_channels), jnp.float32) * np.sqrt(2.0 / in_channels)
    w2 = jax.random.normal(k2, (in_channels, cr), jnp.float32) * np.sqrt(2.0 / cr)
    return w1, w2


def cbam_ref(x, w1, w2):
    # Pure-JAX reference for correctness checking.
    avg_p = jnp.mean(x, axis=(2, 3))                        # (B, C)
    max_p = jnp.max(x, axis=(2, 3))                         # (B, C)

    def mlp(p):
        h = jnp.maximum(jnp.einsum('rc,bc->br', w1, p), 0.0)
        return jnp.einsum('cr,br->bc', w2, h)

    s = jax.nn.sigmoid(mlp(avg_p) + mlp(max_p))             # (B, C)
    return x * s[:, :, None, None]


# ----------------------------- main -------------------------------------------


if __name__ == "__main__":
    key = jax.random.PRNGKey(0)
    k_params, k_x = jax.random.split(key)

    B, C, H, W = 2, 64, 16, 16                              # C//16 = 4
    w1, w2 = init_params(k_params, C)
    x = jax.random.normal(k_x, (B, C, H, W), jnp.float32)

    fwd = jax.jit(cbam_forward)
    out = jax.block_until_ready(fwd(x, w1, w2))

    assert out.shape == (B, C, H, W), out.shape
    assert bool(jnp.all(jnp.isfinite(out)))

    ref = cbam_ref(x, w1, w2)
    np.testing.assert_allclose(np.asarray(out), np.asarray(ref),
                               rtol=1e-5, atol=1e-5)

    print("KERNEL_OK")
</pallas_src>

<mosaic_0001>
module attributes {stable_mosaic.version = 11 : i64} {
  func.func @_cbam_kernel(%arg0: i32, %arg1: memref<1x64x256xf32, #tpu.memory_space<vmem>>, %arg2: memref<4x64xf32, #tpu.memory_space<vmem>>, %arg3: memref<64x4xf32, #tpu.memory_space<vmem>>, %arg4: memref<1x64x256xf32, #tpu.memory_space<vmem>>) attributes {dimension_semantics = [#tpu.dimension_semantics<parallel>], iteration_bounds = array<i64: 2>, scalar_prefetch = 0 : i64, scratch_operands = 0 : i64, tpu.core_type = #tpu.core_type<tc>, window_params = [{transform_indices = @transform_0, window_bounds = array<i64: 1, 64, 256>}, {pipeline_mode = #tpu.pipeline_mode<synchronous>, transform_indices = @transform_1, window_bounds = array<i64: 4, 64>}, {pipeline_mode = #tpu.pipeline_mode<synchronous>, transform_indices = @transform_2, window_bounds = array<i64: 64, 4>}, {transform_indices = @transform_3, window_bounds = array<i64: 1, 64, 256>}]} {
    %c0 = arith.constant 0 : index
    %c0_0 = arith.constant 0 : index
    %c0_1 = arith.constant 0 : index
    %0 = vector.load %arg1[%c0, %c0_0, %c0_1] : memref<1x64x256xf32, #tpu.memory_space<vmem>>, vector<1x64x256xf32>
    %1 = vector.shape_cast %0 : vector<1x64x256xf32> to vector<64x256xf32>
    %cst = arith.constant dense<0.000000e+00> : vector<64xf32>
    %2 = vector.multi_reduction <add>, %1, %cst [1] : vector<64x256xf32> to vector<64xf32>
    %3 = vector.shape_cast %2 : vector<64xf32> to vector<64x1xf32>
    %cst_2 = arith.constant 2.560000e+02 : f32
    %4 = vector.broadcast %cst_2 : f32 to vector<64x1xf32>
    %5 = arith.divf %3, %4 : vector<64x1xf32>
    %cst_3 = arith.constant dense<0xFF800000> : vector<64xf32>
    %6 = vector.multi_reduction <maximumf>, %1, %cst_3 [1] : vector<64x256xf32> to vector<64xf32>
    %7 = vector.shape_cast %6 : vector<64xf32> to vector<64x1xf32>
    %c0_4 = arith.constant 0 : index
    %c0_5 = arith.constant 0 : index
    %8 = vector.load %arg2[%c0_4, %c0_5] : memref<4x64xf32, #tpu.memory_space<vmem>>, vector<4x64xf32>
    %cst_6 = arith.constant dense<0.000000e+00> : vector<4x1xf32>
    %9 = tpu.matmul %8, %5, %cst_6 {dimension_numbers = #tpu.dot_dimension_numbers<[1], [0], [0], [1], [0, 0, 1, 1], [], []>} : vector<4x64xf32>, vector<64x1xf32>, vector<4x1xf32> -> vector<4x1xf32>
    %cst_7 = arith.constant 0.000000e+00 : f32
    %10 = vector.broadcast %cst_7 : f32 to vector<4x1xf32>
    %11 = arith.maximumf %9, %10 : vector<4x1xf32>
    %c0_8 = arith.constant 0 : index
    %c0_9 = arith.constant 0 : index
    %12 = vector.load %arg3[%c0_8, %c0_9] : memref<64x4xf32, #tpu.memory_space<vmem>>, vector<64x4xf32>
    %cst_10 = arith.constant dense<0.000000e+00> : vector<64x1xf32>
    %13 = tpu.matmul %12, %11, %cst_10 {dimension_numbers = #tpu.dot_dimension_numbers<[1], [0], [0], [1], [0, 0, 1, 1], [], []>} : vector<64x4xf32>, vector<4x1xf32>, vector<64x1xf32> -> vector<64x1xf32>
    %c0_11 = arith.constant 0 : index
    %c0_12 = arith.constant 0 : index
    %14 = vector.load %arg2[%c0_11, %c0_12] : memref<4x64xf32, #tpu.memory_space<vmem>>, vector<4x64xf32>
    %cst_13 = arith.constant dense<0.000000e+00> : vector<4x1xf32>
    %15 = tpu.matmul %14, %7, %cst_13 {dimension_numbers = #tpu.dot_dimension_numbers<[1], [0], [0], [1], [0, 0, 1, 1], [], []>} : vector<4x64xf32>, vector<64x1xf32>, vector<4x1xf32> -> vector<4x1xf32>
    %cst_14 = arith.constant 0.000000e+00 : f32
    %16 = vector.broadcast %cst_14 : f32 to vector<4x1xf32>
    %17 = arith.maximumf %15, %16 : vector<4x1xf32>
    %c0_15 = arith.constant 0 : index
    %c0_16 = arith.constant 0 : index
    %18 = vector.load %arg3[%c0_15, %c0_16] : memref<64x4xf32, #tpu.memory_space<vmem>>, vector<64x4xf32>
    %cst_17 = arith.constant dense<0.000000e+00> : vector<64x1xf32>
    %19 = tpu.matmul %18, %17, %cst_17 {dimension_numbers = #tpu.dot_dimension_numbers<[1], [0], [0], [1], [0, 0, 1, 1], [], []>} : vector<64x4xf32>, vector<4x1xf32>, vector<64x1xf32> -> vector<64x1xf32>
    %20 = arith.addf %13, %19 : vector<64x1xf32>
    %cst_18 = arith.constant 0.000000e+00 : f32
    %21 = vector.broadcast %cst_18 : f32 to vector<64x1xf32>
    %22 = arith.subf %21, %20 : vector<64x1xf32>
    %23 = math.exp %22 : vector<64x1xf32>
    %cst_19 = arith.constant 1.000000e+00 : f32
    %24 = vector.broadcast %cst_19 : f32 to vector<64x1xf32>
    %25 = arith.addf %24, %23 : vector<64x1xf32>
    %cst_20 = arith.constant 1.000000e+00 : f32
    %26 = vector.broadcast %cst_20 : f32 to vector<64x1xf32>
    %27 = arith.divf %26, %25 : vector<64x1xf32>
    %28 = vector.broadcast %27 : vector<64x1xf32> to vector<64x256xf32>
    %29 = arith.mulf %1, %28 : vector<64x256xf32>
    %c0_21 = arith.constant 0 : index
    %c0_22 = arith.constant 0 : index
    %c0_23 = arith.constant 0 : index
    %30 = vector.load %arg4[%c0_21, %c0_22, %c0_23] : memref<1x64x256xf32, #tpu.memory_space<vmem>>, vector<1x64x256xf32>
    %31 = vector.shape_cast %30 : vector<1x64x256xf32> to vector<64x256xf32>
    %32 = vector.shape_cast %29 : vector<64x256xf32> to vector<1x64x256xf32>
    tpu.vector_store %arg4[%c0_21, %c0_22, %c0_23], %32 {strides = array<i32>} : memref<1x64x256xf32, #tpu.memory_space<vmem>>, vector<1x64x256xf32>,
    return
  }
  func.func @transform_0(%arg0: i32) -> (i32, i32, i32) {
    %c0_i32 = arith.constant 0 : i32
    %c0_i32_0 = arith.constant 0 : i32
    %c0_i32_1 = arith.constant 0 : i32
    return %arg0, %c0_i32, %c0_i32_0 : i32, i32, i32
  }
  func.func @transform_1(%arg0: i32) -> (i32, i32) {
    %c0_i32 = arith.constant 0 : i32
    %c0_i32_0 = arith.constant 0 : i32
    %c0_i32_1 = arith.constant 0 : i32
    return %c0_i32, %c0_i32_0 : i32, i32
  }
  func.func @transform_2(%arg0: i32) -> (i32, i32) {
    %c0_i32 = arith.constant 0 : i32
    %c0_i32_0 = arith.constant 0 : i32
    %c0_i32_1 = arith.constant 0 : i32
    return %c0_i32, %c0_i32_0 : i32, i32
  }
  func.func @transform_3(%arg0: i32) -> (i32, i32, i32) {
    %c0_i32 = arith.constant 0 : i32
    %c0_i32_0 = arith.constant 0 : i32
    %c0_i32_1 = arith.constant 0 : i32
    return %arg0, %c0_i32, %c0_i32_0 : i32, i32, i32
  }
}

</mosaic_0001>

<bundles_post_ra>
// kernel: cbam_forward.1
= control target key start
LH: loop header
LB: loop body
LE: loop exit
PB: predicated region body
PF: predicated region fallthrough
CT: control target
= control target key end

     0   :  { %s1027_s12 = smov 0   ;;  %s1228_s0 = inlined_call_operand.vmem [shape: f32[2,64,256], index: 0, kind: input, shape index: {}]   ;;  %s1229_s1 = inlined_call_operand.vmem [shape: f32[4,64], index: 1, kind: input, shape index: {}]   ;;  %s1230_s2 = inlined_call_operand.vmem [shape: f32[64,4], index: 2, kind: input, shape index: {}]   ;;  %s1231_s3 = inlined_call_operand.vmem [shape: f32[2,64,256], index: 3, kind: output, shape index: {}]  }
   0x1 LB: > { %s816_s13 = sadd.s32 4294967295, %s1002_s12   ;;  %p820_p0 = scmp.ge.s32.totalorder %s1002_s12, 1  ;;  %s1002_s12 = sphi %s1027_s12, %s13_s12  }
   0x2   : > { %p137_p1 = scmp.lt.s32.totalorder %s1002_s12, 3 }
   0x4   : > { %p138_p2 = pnand %p820_p0, %p137_p1 }
   0x5   : > { %p161_p3 = scmp.lt.s32.totalorder (!%p138_p2), %s816_s13, 1 }
   0x6   : > { %141 = sbr.rel (%p138_p2) target bundleno = 763 (0x2fb), region = 32 }
   0xb   : > { %s1233_s13 = smov (!%p161_p3, %s816_s13), 1  ;;  %v1004_v20 = vmov 0.0   ;;  %vm1005_vm0 = vmmov 0   ;;  %v244_v55 = vld [vmem:[%s1229_s1] sm:$0xf]  ;;  %vm245_vm1 = vcmask 523264  }
   0xc   : > { %s847_s14 = sshll.u32 %s1233_s13, 7  ;;  %885 = vmatprep.subr.mxu0 %v1004_v20  ;;  %904 = vmatprep.subr.mxu1 %v1004_v20  ;;  %v320_v58 = vld [vmem:[%s1230_s2] sm:$0xff]  ;;  %vm399_vm2 = vcmask 31744   ;;  %vm424_vm3 = vcmask 1043456   ;;  %v321_v62 = vld [vmem:[%s1230_s2 + $0x8] sm:$0xff]  ;;  %v322_v63 = vld [vmem:[%s1230_s2 + $0x10] sm:$0xff] }
   0xd   : > { %s1043_s17 = scalar_lea.vmem %s1228_s0, %s847_s14  ;;  %901 = vmatprep.mubr.msk.f32.mxu0 %vm1005_vm0, %v1004_v20  ;;  %920 = vmatprep.mubr.msk.f32.mxu1 %vm1005_vm0, %v1004_v20  ;;  %s1191_s11 = scalar_lea.vmem %s1231_s3, %s847_s14 }
   0xe   : > { %v1046_v0 = vld [vmem:[%s1043_s17 + $0x70] sm:$0xff]  ;;  %v1049_v1 = vld [vmem:[%s1043_s17 + $0x78] sm:$0xff]  ;;  %v1052_v2 = vld [vmem:[%s1043_s17 + $0x60] sm:$0xff] }
   0xf   : > { %v208_v3 = vadd.f32 %v1049_v1, %v1046_v0  ;;  %v241_v4 = vmax.f32 %v1046_v0, %v1049_v1  ;;  %v1059_v5 = vld [vmem:[%s1043_s17 + $0x68] sm:$0xff]  ;;  %v1062_v6 = vld [vmem:[%s1043_s17 + $0x50] sm:$0xff]  ;;  %v1065_v7 = vld [vmem:[%s1043_s17 + $0x58] sm:$0xff] }
  0x10   : > { %v205_v8 = vadd.f32 %v1059_v5, %v1052_v2  ;;  %v202_v9 = vadd.f32 %v1065_v7, %v1062_v6  ;;  %v1072_v10 = vld [vmem:[%s1043_s17 + $0x40] sm:$0xff]  ;;  %v1075_v11 = vld [vmem:[%s1043_s17 + $0x48] sm:$0xff]  ;;  %v238_v12 = vmax.f32 %v1052_v2, %v1059_v5  ;;  %v1082_v14 = vld [vmem:[%s1043_s17 + $0x30] sm:$0xff]  ;;  %v235_v16 = vmax.f32 %v1062_v6, %v1065_v7 }
  0x11   : > { %209 = vadd.xlane.f32.xlu0 %v208_v3  ;;  %242 = vmax.xlane.f32.xlu1 %v241_v4  ;;  %v199_v13 = vadd.f32 %v1075_v11, %v1072_v10  ;;  %v1085_v15 = vld [vmem:[%s1043_s17 + $0x38] sm:$0xff]  ;;  %v1092_v18 = vld [vmem:[%s1043_s17 + $0x20] sm:$0xff]  ;;  %v1095_v19 = vld [vmem:[%s1043_s17 + $0x28] sm:$0xff]  ;;  %v232_v21 = vmax.f32 %v1072_v10, %v1075_v11 }
  0x12   : > { %v196_v17 = vadd.f32 %v1085_v15, %v1082_v14  ;;  %v193_v22 = vadd.f32 %v1095_v19, %v1092_v18  ;;  %v1104_v23 = vld [vmem:[%s1043_s17 + $0x10] sm:$0xff]  ;;  %v1107_v24 = vld [vmem:[%s1043_s17 + $0x18] sm:$0xff]  ;;  %v229_v25 = vmax.f32 %v1082_v14, %v1085_v15  ;;  %v1114_v27 = vld [vmem:[%s1043_s17] sm:$0xff]  ;;  %v226_v29 = vmax.f32 %v1092_v18, %v1095_v19 }
  0x13   : > { %v190_v26 = vadd.f32 %v1107_v24, %v1104_v23  ;;  %v1117_v28 = vld [vmem:[%s1043_s17 + $0x8] sm:$0xff]  ;;  %v223_v31 = vmax.f32 %v1104_v23, %v1107_v24 }
  0x14   : > { %v187_v30 = vadd.f32 %v1117_v28, %v1114_v27  ;;  %v220_v32 = vmax.f32 %v1114_v27, %v1117_v28 }
  0x15   : > { %206 = vadd.xlane.f32.xlu0 %v205_v8  ;;  %203 = vadd.xlane.f32.xlu1 %v202_v9  ;;  %v323_v9 = vld [vmem:[%s1230_s2 + $0x18] sm:$0xff] }
  0x19   : > { %239 = vmax.xlane.f32.xlu0 %v238_v12  ;;  %200 = vadd.xlane.f32.xlu1 %v199_v13  ;;  %v324_v12 = vld [vmem:[%s1230_s2 + $0x20] sm:$0xff]  ;;  %v325_v13 = vld [vmem:[%s1230_s2 + $0x28] sm:$0xff] }
  0x1d   : > { %236 = vmax.xlane.f32.xlu0 %v235_v16  ;;  %197 = vadd.xlane.f32.xlu1 %v196_v17  ;;  %v326_v16 = vld [vmem:[%s1230_s2 + $0x30] sm:$0xff]  ;;  %v327_v17 = vld [vmem:[%s1230_s2 + $0x38] sm:$0xff] }
  0x21   : > { %233 = vmax.xlane.f32.xlu0 %v232_v21  ;;  %194 = vadd.xlane.f32.xlu1 %v193_v22 }
  0x25   : > { %230 = vmax.xlane.f32.xlu0 %v229_v25  ;;  %191 = vadd.xlane.f32.xlu1 %v190_v26 }
  0x29   : > { %227 = vmax.xlane.f32.xlu0 %v226_v29  ;;  %188 = vadd.xlane.f32.xlu1 %v187_v30 }
  0x2d   : > { %224 = vmax.xlane.f32.xlu0 %v223_v31  ;;  %221 = vmax.xlane.f32.xlu1 %v220_v32 }
  0x9a   : > { %v210_v33 = vpop.xlane.xlu0 %209  ;;  %v243_v34 = vpop.xlane.xlu1 %242 }
  0x9b   : > { %v219_v35 = vmul.f32 0.00390625, %v210_v33  ;;  %905 = vmatpush3.msra.mxu1 %v243_v34 }
  0x9c   : > { %906 = vmatprep.subr.mxu1 %v1004_v20 }
  0x9d   : > { %886 = vmatpush3.msra.mxu0 %v219_v35 }
  0x9e   : > { %v207_v36 = vpop.xlane.xlu0 %206  ;;  %887 = vmatprep.subr.mxu0 %v1004_v20  ;;  %v204_v37 = vpop.xlane.xlu1 %203 }
  0x9f   : > { %v218_v38 = vmul.f32 0.00390625, %v207_v36  ;;  %v217_v39 = vmul.f32 0.00390625, %v204_v37 }
  0xa1   : > { %888 = vmatpush3.msra.mxu0 %v218_v38 }
  0xa2   : > { %889 = vmatprep.subr.mxu0 %v1004_v20  ;;  %v240_v40 = vpop.xlane.xlu0 %239  ;;  %v201_v41 = vpop.xlane.xlu1 %200 }
  0xa3   : > { %890 = vmatpush3.msra.mxu0 %v217_v39  ;;  %907 = vmatpush3.msra.mxu1 %v240_v40  ;;  %v216_v42 = vmul.f32 0.00390625, %v201_v41 }
  0xa4   : > { %908 = vmatprep.subr.mxu1 %v1004_v20  ;;  %891 = vmatprep.subr.mxu0 %v1004_v20 }
  0xa5   : > { %892 = vmatpush3.msra.mxu0 %v216_v42 }
  0xa6   : > { %v237_v43 = vpop.xlane.xlu0 %236  ;;  %v198_v44 = vpop.xlane.xlu1 %197  ;;  %893 = vmatprep.subr.mxu0 %v1004_v20 }
  0xa7   : > { %909 = vmatpush3.msra.mxu1 %v237_v43  ;;  %v215_v45 = vmul.f32 0.00390625, %v198_v44 }
  0xa8   : > { %910 = vmatprep.subr.mxu1 %v1004_v20 }
  0xa9   : > { %894 = vmatpush3.msra.mxu0 %v215_v45 }
  0xaa   : > { %v234_v46 = vpop.xlane.xlu0 %233  ;;  %v195_v47 = vpop.xlane.xlu1 %194  ;;  %895 = vmatprep.subr.mxu0 %v1004_v20 }
  0xab   : > { %911 = vmatpush3.msra.mxu1 %v234_v46  ;;  %v214_v48 = vmul.f32 0.00390625, %v195_v47 }
  0xac   : > { %912 = vmatprep.subr.mxu1 %v1004_v20 }
  0xad   : > { %896 = vmatpush3.msra.mxu0 %v214_v48 }
  0xae   : > { %v231_v49 = vpop.xlane.xlu0 %230  ;;  %v192_v50 = vpop.xlane.xlu1 %191  ;;  %897 = vmatprep.subr.mxu0 %v1004_v20 }
  0xaf   : > { %913 = vmatpush3.msra.mxu1 %v231_v49  ;;  %v213_v51 = vmul.f32 0.00390625, %v192_v50 }
  0xb0   : > { %914 = vmatprep.subr.mxu1 %v1004_v20 }
  0xb1   : > { %898 = vmatpush3.msra.mxu0 %v213_v51 }
  0xb2   : > { %v228_v52 = vpop.xlane.xlu0 %227  ;;  %v189_v53 = vpop.xlane.xlu1 %188  ;;  %899 = vmatprep.subr.mxu0 %v1004_v20 }
  0xb3   : > { %915 = vmatpush3.msra.mxu1 %v228_v52  ;;  %v212_v54 = vmul.f32 0.00390625, %v189_v53 }
  0xb4   : > { %916 = vmatprep.subr.mxu1 %v1004_v20 }
  0xb5   : > { %900 = vmatpush3.msra.mxu0 %v212_v54 }
  0xb6   : > { %v225_v56 = vpop.xlane.xlu0 %224  ;;  %902 = vmatmul.mubr.msk.f32.vlgmr.msra.gmra.mxu0 %vm245_vm1, %v244_v55  ;;  %v222_v57 = vpop.xlane.xlu1 %221 }
  0xb7   : > { %917 = vmatpush3.msra.mxu1 %v225_v56  ;;  %925 = vmatprep.mubr.msk.f32.mxu0 %vm399_vm2, %v320_v58 }
  0xb8   : > { %918 = vmatprep.subr.mxu1 %v1004_v20  ;;  %v1006_v20 = vmov 0  }
  0xb9   : > { %919 = vmatpush3.msra.mxu1 %v222_v57  ;;  %963 = vset.pattern.permute.xlu1 %v1006_v20 }
  0xba   : > { %921 = vmatmul.mubr.msk.f32.vlgmr.msra.gmra.mxu1 %vm245_vm1, %v244_v55  ;;  %962 = vset.pattern.permute.xlu0 %v1006_v20 }
  0xbb   : > { %939 = vmatprep.mubr.msk.f32.mxu1 %vm399_vm2, %v320_v58 }
 0x176   : > { %v315_v59 = vpop.f32.mrf.mxu0 }
 0x177   : > { %v319_v60 = vmax.f32 %v315_v59, 0.0 }
 0x178   : > { %v903_v61 = vpop.f32.mrf.mxu0 }
 0x179   : > { %937 = vmatprep.subr.msk.mxu1 %vm424_vm3, %v319_v60 }
 0x17a   : > { %v394_v3 = vpop.f32.mrf.mxu1  ;;  %938 = vmatpush3.msk.msra.mxu1 %vm424_vm3, %v319_v60 }
 0x17b   : > { %v398_v4 = vmax.f32 %v394_v3, 0.0  ;;  %940 = vmatmul.mubr.msk.f32.vlgmr.msra.gmra.mxu1 %vm399_vm2, %v321_v62 }
 0x17c   : > { %v922_v8 = vpop.f32.mrf.mxu1  ;;  %942 = vmatprep.mubr.msk.f32.mxu1 %vm399_vm2, %v322_v63 }
 0x17d   : > { %923 = vmatprep.subr.msk.mxu0 %vm424_vm3, %v398_v4 }
 0x17e   : > { %924 = vmatpush3.msk.msra.mxu0 %vm424_vm3, %v398_v4 }
 0x17f   : > { %926 = vmatmul.mubr.msk.f32.vlgmr.msra.gmra.mxu0 %vm399_vm2, %v321_v62  ;;  %943 = vmatmul.mubr.msk.f32.gmra.mxu1 %vm399_vm2, %v323_v9 }
 0x180   : > { %928 = vmatprep.mubr.msk.f32.mxu0 %vm399_vm2, %v322_v63  ;;  %945 = vmatprep.mubr.msk.f32.mxu1 %vm399_vm2, %v324_v12 }
 0x183   : > { %929 = vmatmul.mubr.msk.f32.gmra.mxu0 %vm399_vm2, %v323_v9  ;;  %946 = vmatmul.mubr.msk.f32.gmra.mxu1 %vm399_vm2, %v325_v13 }
 0x184   : > { %931 = vmatprep.mubr.msk.f32.mxu0 %vm399_vm2, %v324_v12  ;;  %948 = vmatprep.mubr.msk.f32.mxu1 %vm399_vm2, %v326_v16 }
 0x187   : > { %932 = vmatmul.mubr.msk.f32.gmra.mxu0 %vm399_vm2, %v325_v13  ;;  %949 = vmatmul.mubr.msk.f32.gmra.mxu1 %vm399_vm2, %v327_v17 }
 0x188   : > { %934 = vmatprep.mubr.msk.f32.mxu0 %vm399_vm2, %v326_v16 }
 0x18b   : > { %935 = vmatmul.mubr.msk.f32.gmra.mxu0 %vm399_vm2, %v327_v17 }
 0x23b   : > { %v941_v21 = vpop.f32.mrf.mxu1 }
 0x23d   : > { %v602_v22 = vpop.f32.mrf.mxu1 }
 0x23f   : > { %v927_v25 = vpop.f32.mrf.mxu0  ;;  %v944_v26 = vpop.f32.mrf.mxu1 }
 0x240   : > { %v608_v29 = vadd.f32 %v941_v21, %v927_v25 }
 0x241   : > { %v494_v30 = vpop.f32.mrf.mxu0  ;;  %v612_v31 = vpop.f32.mrf.mxu1 }
 0x242   : > { %v642_v32 = vsub.f32 0.0, %v608_v29  ;;  %v603_v33 = vadd.f32 %v602_v22, %v494_v30 }
 0x243   : > { %v930_v34 = vpop.f32.mrf.mxu0  ;;  %v947_v35 = vpop.f32.mrf.mxu1 }
 0x244   : > { %v651_v36 = vmul.f32 1.442695, %v642_v32  ;;  %v641_v37 = vsub.f32 0.0, %v603_v33  ;;  %v618_v38 = vadd.f32 %v944_v26, %v930_v34 }
 0x245   : > { %v504_v39 = vpop.f32.mrf.mxu0  ;;  %v622_v40 = vpop.f32.mrf.mxu1 }
 0x246   : > { %964 = vpow2.f32 %v651_v36  ;;  %v649_v41 = vmul.f32 1.442695, %v641_v37  ;;  %v644_v42 = vsub.f32 0.0, %v618_v38  ;;  %v613_v43 = vadd.f32 %v612_v31, %v504_v39 }
 0x247   : > { %v933_v44 = vpop.f32.mrf.mxu0  ;;  %v950_v45 = vpop.f32.mrf.mxu1 }
 0x248   : > { %966 = vpow2.f32 %v649_v41  ;;  %v655_v46 = vmul.f32 1.442695, %v644_v42  ;;  %v643_v47 = vsub.f32 0.0, %v613_v43  ;;  %v628_v48 = vadd.f32 %v947_v35, %v933_v44 }
 0x249   : > { %v514_v49 = vpop.f32.mrf.mxu0  ;;  %v632_v54 = vpop.f32.mrf.mxu1 }
 0x24a   : > { %968 = vpow2.f32 %v655_v46  ;;  %v653_v50 = vmul.f32 1.442695, %v643_v47  ;;  %v646_v51 = vsub.f32 0.0, %v628_v48  ;;  %v623_v52 = vadd.f32 %v622_v40, %v514_v49 }
 0x24b   : > { %v936_v53 = vpop.f32.mrf.mxu0 }
 0x24c   : > { %970 = vpow2.f32 %v653_v50  ;;  %v659_v55 = vmul.f32 1.442695, %v646_v51  ;;  %v645_v56 = vsub.f32 0.0, %v623_v52  ;;  %v638_v57 = vadd.f32 %v950_v45, %v936_v53 }
 0x24d   : > { %v524_v58 = vpop.f32.mrf.mxu0 }
 0x24e   : > { %972 = vpow2.f32 %v659_v55  ;;  %v657_v59 = vmul.f32 1.442695, %v645_v56  ;;  %v633_v60 = vadd.f32 %v632_v54, %v524_v58  ;;  %v648_v62 = vsub.f32 0.0, %v638_v57 }
 0x250   : > { %v647_v61 = vsub.f32 0.0, %v633_v60  ;;  %974 = vpow2.f32 %v657_v59  ;;  %v663_v9 = vmul.f32 1.442695, %v648_v62 }
 0x252   : > { %v661_v63 = vmul.f32 1.442695, %v647_v61 }
 0x253   : > { %v965_v3 = vpop.eup %964 }
 0x254   : > { %v666_v4 = vadd.f32 1.0, %v965_v3  ;;  %976 = vpow2.f32 %v661_v63 }
 0x255   : > { %v967_v8 = vpop.eup %966 }
 0x256   : > { %978 = vrcp.f32 %v666_v4  ;;  %v665_v12 = vadd.f32 1.0, %v967_v8 }
 0x257   : > { %v969_v13 = vpop.eup %968 }
 0x258   : > { %980 = vrcp.f32 %v665_v12  ;;  %v668_v16 = vadd.f32 1.0, %v969_v13 }
 0x259   : > { %v971_v17 = vpop.eup %970  ;;  %982 = vpow2.f32 %v663_v9 }
 0x25a   : > { %984 = vrcp.f32 %v668_v16  ;;  %v667_v20 = vadd.f32 1.0, %v971_v17 }
 0x25b   : > { %v973_v21 = vpop.eup %972 }
 0x25c   : > { %v670_v22 = vadd.f32 1.0, %v973_v21  ;;  %986 = vrcp.f32 %v667_v20 }
 0x25d   : > { %v975_v25 = vpop.eup %974 }
 0x25e   : > { %988 = vrcp.f32 %v670_v22  ;;  %v669_v29 = vadd.f32 1.0, %v975_v25 }
 0x260   : > { %990 = vrcp.f32 %v669_v29 }
 0x261   : > { %v977_v26 = vpop.eup %976 }
 0x262   : > { %v671_v33 = vadd.f32 1.0, %v977_v26 }
 0x263   : > { %v979_v30 = vpop.eup %978 }
 0x264   : > { %696 = vperm.xlu1 %963, %v979_v30   ;;  %992 = vrcp.f32 %v671_v33 }
 0x265   : > { %v981_v31 = vpop.eup %980 }
 0x266   : > { %v983_v32 = vpop.eup %982  ;;  %691 = vperm.xlu0 %962, %v981_v31  }
 0x267   : > { %v985_v34 = vpop.eup %984  ;;  %v672_v35 = vadd.f32 1.0, %v983_v32 }
 0x268   : > { %706 = vperm.xlu1 %963, %v985_v34  }
 0x269   : > { %v987_v36 = vpop.eup %986  ;;  %994 = vrcp.f32 %v672_v35 }
 0x26b   : > { %v989_v37 = vpop.eup %988 }
 0x26c   : > { %701 = vperm.xlu1 %963, %v987_v36  }
 0x26d   : > { %v991_v38 = vpop.eup %990 }
 0x270   : > { %716 = vperm.xlu1 %963, %v989_v37  }
 0x271   : > { %v993_v39 = vpop.eup %992 }
 0x274   : > { %711 = vperm.xlu1 %963, %v991_v38  }
 0x276   : > { %v995_v40 = vpop.eup %994 }
 0x278   : > { %721 = vperm.xlu1 %963, %v993_v39  }
 0x27c   : > { %726 = vperm.xlu1 %963, %v995_v40  }
 0x2df   : > { %v697_v41 = vpop.permute.xlu1 %696 }
 0x2e0   : > { %v731_v42 = vmul.f32 %v697_v41, %v1104_v23  ;;  %v732_v43 = vmul.f32 %v697_v41, %v1107_v24 }
 0x2e1   : > { %v692_v44 = vpop.permute.xlu0 %691 }
 0x2e2   : > { %747 = vst [vmem:[%s1191_s11 + $0x10] sm:$0xff] %v731_v42  ;;  %748 = vst [vmem:[%s1191_s11 + $0x18] sm:$0xff] %v732_v43  ;;  %v729_v45 = vmul.f32 %v692_v44, %v1114_v27  ;;  %v730_v46 = vmul.f32 %v692_v44, %v1117_v28 }
 0x2e3   : > { %v707_v47 = vpop.permute.xlu1 %706 }
 0x2e4   : > { %745 = vst [vmem:[%s1191_s11] sm:$0xff] %v729_v45  ;;  %746 = vst [vmem:[%s1191_s11 + $0x8] sm:$0xff] %v730_v46  ;;  %v735_v48 = vmul.f32 %v707_v47, %v1082_v14  ;;  %v736_v23 = vmul.f32 %v707_v47, %v1085_v15 }
 0x2e6   : > { %751 = vst [vmem:[%s1191_s11 + $0x30] sm:$0xff] %v735_v48  ;;  %752 = vst [vmem:[%s1191_s11 + $0x38] sm:$0xff] %v736_v23 }
 0x2e7   : > { %v702_v24 = vpop.permute.xlu1 %701 }
 0x2e8   : > { %v733_v49 = vmul.f32 %v702_v24, %v1092_v18  ;;  %v734_v27 = vmul.f32 %v702_v24, %v1095_v19 }
 0x2ea   : > { %749 = vst [vmem:[%s1191_s11 + $0x20] sm:$0xff] %v733_v49  ;;  %750 = vst [vmem:[%s1191_s11 + $0x28] sm:$0xff] %v734_v27 }
 0x2eb   : > { %v717_v28 = vpop.permute.xlu1 %716 }
 0x2ec   : > { %v739_v50 = vmul.f32 %v717_v28, %v1062_v6  ;;  %v740_v14 = vmul.f32 %v717_v28, %v1065_v7 }
 0x2ee   : > { %755 = vst [vmem:[%s1191_s11 + $0x50] sm:$0xff] %v739_v50  ;;  %756 = vst [vmem:[%s1191_s11 + $0x58] sm:$0xff] %v740_v14 }
 0x2ef   : > { %v712_v15 = vpop.permute.xlu1 %711 }
 0x2f0   : > { %v737_v51 = vmul.f32 %v712_v15, %v1072_v10  ;;  %v738_v18 = vmul.f32 %v712_v15, %v1075_v11 }
 0x2f2   : > { %753 = vst [vmem:[%s1191_s11 + $0x40] sm:$0xff] %v737_v51  ;;  %754 = vst [vmem:[%s1191_s11 + $0x48] sm:$0xff] %v738_v18 }
 0x2f3   : > { %v722_v19 = vpop.permute.xlu1 %721 }
 0x2f4   : > { %v741_v52 = vmul.f32 %v722_v19, %v1052_v2  ;;  %v742_v53 = vmul.f32 %v722_v19, %v1059_v5 }
 0x2f6   : > { %757 = vst [vmem:[%s1191_s11 + $0x60] sm:$0xff] %v741_v52  ;;  %758 = vst [vmem:[%s1191_s11 + $0x68] sm:$0xff] %v742_v53 }
 0x2f7   : > { %v727_v6 = vpop.permute.xlu1 %726 }
 0x2f8   : > { %v743_v7 = vmul.f32 %v727_v6, %v1046_v0  ;;  %v744_v54 = vmul.f32 %v727_v6, %v1049_v1 }
 0x2fa   : > { %759 = vst [vmem:[%s1191_s11 + $0x70] sm:$0xff] %v743_v7  ;;  %760 = vst [vmem:[%s1191_s11 + $0x78] sm:$0xff] %v744_v54 }
 0x2fb PF: > { %s13_s12 = sadd.s32 1, %s1002_s12  }
 0x2fc   : > { %p10_p4 = scmp.ge.s32.totalorder %s13_s12, 4  }
 0x2fe   :  { %12 = sbr.rel (!%p10_p4) target bundleno = 1 (0x1), region = 62 }

</bundles_post_ra>
